<compile_context>
chip_gen: v5e
topology: v5e:2x2
jax: 0.10.0
libtpu: 0.0.40
codegen_flags: <defaults>
</compile_context>

<pallas_src>
import functools
import math

import jax
import jax.numpy as jnp
from jax import lax
from jax.experimental import pallas as pl
from jax.experimental.pallas import tpu as pltpu


def mha_kernel(x_ref, wqkv_ref, wproj_ref, bias_ref, o_ref,
               *, num_heads, head_size, seq_len):
    """Fused causal MHA + output projection for one block of batch elements.

    x_ref    : (N, C)       f32, N = batch_block * T rows, row-major (bb, t)
    wqkv_ref : (C, 3*H*hs)  bf16, columns ordered [q|k|v][head][dim];
                            1/sqrt(hs) already folded into the Q columns
    wproj_ref: (C, C)       bf16 (transposed: out = concat_heads @ Wproj)
    bias_ref : (1, C)       f32
    o_ref    : (N, C)       f32
    """
    H, hs, T = num_heads, head_size, seq_len
    N, C = x_ref.shape
    BB = N // T                       # batch elements folded into this block
    G = H * BB                        # (head, batch) groups for attention matmuls

    # bf16 feeds the MXU at full rate; every matmul accumulates in f32.
    x = x_ref[...].astype(jnp.bfloat16)                               # (N, C)

    # ---- 1) single lane-dense QKV matmul (one MXU stream, K = C deep) -------
    qkv = jnp.dot(x, wqkv_ref[...],
                  preferred_element_type=jnp.float32)                 # (N, 3*H*hs)
    qkv = qkv.astype(jnp.bfloat16)

    # Regroup heads to a major (batch) dim with static lane slices + stack.
    # Cheap relative to the matmuls; a flash-style kernel would instead put
    # heads on the grid.
    def heads_major(base):            # base: 0 = q, 1 = k, 2 = v
        cols = [qkv[:, (base * H + h) * hs:(base * H + h + 1) * hs]
                for h in range(H)]                                     # H x (N, hs)
        return jnp.stack(cols, axis=0).reshape(G, T, hs)               # (H*BB, T, hs)

    q = heads_major(0)
    k = heads_major(1)
    v = heads_major(2)

    # ---- 2) causal scores (scale already folded into Wq) --------------------
    # Contracting the last dim of both operands -> MXU trans-rhs, no vxpose.
    s = jnp.einsum('gtd,gsd->gts', q, k,
                   preferred_element_type=jnp.float32)                 # (G, T, T)
    row = lax.broadcasted_iota(jnp.int32, (T, T), 0)
    col = lax.broadcasted_iota(jnp.int32, (T, T), 1)
    # Large finite negative instead of -inf: NaN-safe under max-subtraction.
    s = jnp.where((row >= col)[None, :, :], s, jnp.float32(-1e30))

    # ---- 3) softmax, all statistics in f32 (v5e: no bf16 VPU/EUP path) ------
    s = s - jnp.max(s, axis=-1, keepdims=True)
    p = jnp.exp(s)
    p = p * pl.reciprocal(jnp.sum(p, axis=-1, keepdims=True), approx=True)
    # TODO(synk): attention dropout omitted (eval mode -> identity).

    # ---- 4) p @ v ------------------------------------------------------------
    o = jnp.einsum('gts,gsd->gtd', p.astype(jnp.bfloat16), v,
                   preferred_element_type=jnp.float32)                 # (G, T, hs)

    # ---- 5) output projection as ONE (N, H*hs) @ (H*hs, C) matmul -----------
    # Re-lay heads along the lane axis (mirrors torch.cat(head outs, dim=-1))
    # via static major-dim slices + a lane concat; no (H, N, C) intermediate.
    o = o.reshape(H, N, hs).astype(jnp.bfloat16)
    o_lanes = jnp.concatenate([o[h] for h in range(H)], axis=-1)        # (N, H*hs)
    out = jnp.dot(o_lanes, wproj_ref[...],
                  preferred_element_type=jnp.float32) + bias_ref[...]   # (N, C) f32
    # TODO(synk): output dropout omitted (eval mode -> identity).
    o_ref[...] = out.astype(o_ref.dtype)


def multi_head_attention(x, wq, wk, wv, w_proj, b_proj,
                         *, num_heads, head_size, batch_block=None):
    """x: (B, T, C). wq/wk/wv: (C, H*hs) pre-transposed per-head Linear weights
    (column block h = head h). w_proj: (C, C) transposed, b_proj: (1, C)."""
    B, T, C = x.shape
    H, hs = num_heads, head_size
    assert C == H * hs

    if batch_block is None:
        # nb >= 2 whenever B >= 2: lets the parallel batch axis split across
        # v7x's two TensorCores and gives the pipeline steps to overlap.
        batch_block = 1
    assert B % batch_block == 0
    nb = B // batch_block
    rows = batch_block * T

    scale = 1.0 / math.sqrt(head_size)
    # Fused lane-dense QKV weight (C, 3*H*hs); 1/sqrt(hs) folded into Q columns.
    w_qkv = jnp.concatenate([wq * scale, wk, wv], axis=1).astype(jnp.bfloat16)
    w_p = w_proj.astype(jnp.bfloat16)

    # Lane-dense (B*T, C) activation slab.  x stays f32 at the interface so the
    # 8-row blocks satisfy the f32 sublane tiling; it is cast to bf16 in-kernel.
    x_flat = x.reshape(B * T, C)

    flops = (2 * B * T * C * (3 * H * hs)       # QKV matmul
             + 2 * B * H * T * T * hs * 2       # scores + p@v
             + 2 * B * T * C * C)               # output projection
    cost = pl.CostEstimate(
        flops=flops,
        transcendentals=B * H * T * T,          # softmax exp
        bytes_accessed=(x_flat.size * 4 + B * T * C * 4
                        + w_qkv.size * 2 + w_p.size * 2 + b_proj.size * 4))

    kernel = functools.partial(mha_kernel, num_heads=H, head_size=hs, seq_len=T)
    out_flat = pl.pallas_call(
        kernel,
        out_shape=jax.ShapeDtypeStruct((B * T, C), x.dtype),
        grid_spec=pltpu.PrefetchScalarGridSpec(
            num_scalar_prefetch=0,
            grid=(nb,),
            in_specs=[
                pl.BlockSpec((rows, C), lambda b: (b, 0)),            # x rows
                pl.BlockSpec((C, 3 * H * hs), lambda b: (0, 0)),      # fused QKV W
                pl.BlockSpec((C, C), lambda b: (0, 0)),               # proj W
                pl.BlockSpec((1, C), lambda b: (0, 0)),               # proj bias
            ],
            out_specs=pl.BlockSpec((rows, C), lambda b: (b, 0)),
        ),
        compiler_params=pltpu.CompilerParams(
            dimension_semantics=("parallel",),
            vmem_limit_bytes=48 * 1024 * 1024,
        ),
        cost_estimate=cost,
    )(x_flat, w_qkv, w_p, b_proj)
    return out_flat.reshape(B, T, C)


def reference_mha(x, wq, wk, wv, w_proj, b_proj, *, num_heads, head_size):
    """Pure-JAX f32 reference mirroring the PyTorch module (eval mode)."""
    B, T, C = x.shape
    outs = []
    causal = jnp.tril(jnp.ones((T, T), dtype=bool))
    for h in range(num_heads):
        sl = slice(h * head_size, (h + 1) * head_size)
        q = x @ wq[:, sl]
        k = x @ wk[:, sl]
        v = x @ wv[:, sl]
        s = (q @ jnp.swapaxes(k, -2, -1)) / math.sqrt(head_size)
        s = jnp.where(causal, s, -jnp.inf)
        p = jax.nn.softmax(s, axis=-1)
        outs.append(p @ v)
    concat = jnp.concatenate(outs, axis=-1)
    return concat @ w_proj + b_proj[0]


if __name__ == "__main__":
    B, T = 2, 8
    num_heads, head_size = 4, 8
    embed_size = num_heads * head_size    # 32

    key = jax.random.PRNGKey(0)
    k_x, k_q, k_k, k_v, k_p, k_b = jax.random.split(key, 6)

    bound = 1.0 / math.sqrt(embed_size)   # nn.Linear-style uniform init bound
    x = jax.random.normal(k_x, (B, T, embed_size), jnp.float32)
    # Per-head Linear(embed, head_size, bias=False) weights, concatenated and
    # stored transposed as (embed, num_heads*head_size) so q = x @ Wq.
    wq = jax.random.uniform(k_q, (embed_size, num_heads * head_size), jnp.float32, -bound, bound)
    wk = jax.random.uniform(k_k, (embed_size, num_heads * head_size), jnp.float32, -bound, bound)
    wv = jax.random.uniform(k_v, (embed_size, num_heads * head_size), jnp.float32, -bound, bound)
    # proj: Linear(embed, embed) with bias, stored transposed.
    w_proj = jax.random.uniform(k_p, (embed_size, embed_size), jnp.float32, -bound, bound)
    b_proj = jax.random.uniform(k_b, (1, embed_size), jnp.float32, -bound, bound)

    out = multi_head_attention(x, wq, wk, wv, w_proj, b_proj,
                               num_heads=num_heads, head_size=head_size)
    out = jax.block_until_ready(out)

    ref = reference_mha(x, wq, wk, wv, w_proj, b_proj,
                        num_heads=num_heads, head_size=head_size)
    assert out.shape == (B, T, embed_size)
    # Tolerance covers bf16 matmul inputs (f32 accumulation) and the
    # approximate EUP reciprocal in the softmax.
    assert jnp.allclose(out, ref, atol=2e-2, rtol=2e-2), "mismatch vs JAX reference"

    print("KERNEL_OK")
</pallas_src>

<mosaic_0001>
module attributes {stable_mosaic.version = 11 : i64} {
  func.func @mha_kernel(%arg0: i32, %arg1: memref<8x32xf32, #tpu.memory_space<vmem>>, %arg2: memref<32x96xbf16, #tpu.memory_space<vmem>>, %arg3: memref<32x32xbf16, #tpu.memory_space<vmem>>, %arg4: memref<1x32xf32, #tpu.memory_space<vmem>>, %arg5: memref<8x32xf32, #tpu.memory_space<vmem>>) attributes {dimension_semantics = [#tpu.dimension_semantics<parallel>], iteration_bounds = array<i64: 2>, scalar_prefetch = 0 : i64, scratch_operands = 0 : i64, tpu.core_type = #tpu.core_type<tc>, window_params = [{transform_indices = @transform_0, window_bounds = array<i64: 8, 32>}, {pipeline_mode = #tpu.pipeline_mode<synchronous>, transform_indices = @transform_1, window_bounds = array<i64: 32, 96>}, {pipeline_mode = #tpu.pipeline_mode<synchronous>, transform_indices = @transform_2, window_bounds = array<i64: 32, 32>}, {pipeline_mode = #tpu.pipeline_mode<synchronous>, transform_indices = @transform_3, window_bounds = array<i64: 1, 32>}, {transform_indices = @transform_4, window_bounds = array<i64: 8, 32>}]} {
    %c0 = arith.constant 0 : index
    %c0_0 = arith.constant 0 : index
    %0 = vector.load %arg1[%c0, %c0_0] : memref<8x32xf32, #tpu.memory_space<vmem>>, vector<8x32xf32>
    %1 = arith.truncf %0 : vector<8x32xf32> to vector<8x32xbf16>
    %c0_1 = arith.constant 0 : index
    %c0_2 = arith.constant 0 : index
    %2 = vector.load %arg2[%c0_1, %c0_2] : memref<32x96xbf16, #tpu.memory_space<vmem>>, vector<32x96xbf16>
    %cst = arith.constant dense<0.000000e+00> : vector<8x96xf32>
    %3 = tpu.matmul %1, %2, %cst {dimension_numbers = #tpu.dot_dimension_numbers<[1], [0], [0], [1], [0, 0, 1, 1], [], []>} : vector<8x32xbf16>, vector<32x96xbf16>, vector<8x96xf32> -> vector<8x96xf32>
    %4 = arith.truncf %3 : vector<8x96xf32> to vector<8x96xbf16>
    %5 = vector.extract_strided_slice %4 {offsets = [0, 0], sizes = [8, 8], strides = [1, 1]} : vector<8x96xbf16> to vector<8x8xbf16>
    %6 = vector.extract_strided_slice %4 {offsets = [0, 8], sizes = [8, 8], strides = [1, 1]} : vector<8x96xbf16> to vector<8x8xbf16>
    %7 = vector.extract_strided_slice %4 {offsets = [0, 16], sizes = [8, 8], strides = [1, 1]} : vector<8x96xbf16> to vector<8x8xbf16>
    %8 = vector.extract_strided_slice %4 {offsets = [0, 24], sizes = [8, 8], strides = [1, 1]} : vector<8x96xbf16> to vector<8x8xbf16>
    %9 = vector.shape_cast %5 : vector<8x8xbf16> to vector<1x8x8xbf16>
    %10 = vector.shape_cast %6 : vector<8x8xbf16> to vector<1x8x8xbf16>
    %11 = vector.shape_cast %7 : vector<8x8xbf16> to vector<1x8x8xbf16>
    %12 = vector.shape_cast %8 : vector<8x8xbf16> to vector<1x8x8xbf16>
    %13 = tpu.concatenate %9, %10, %11, %12 in 0 : vector<1x8x8xbf16>, vector<1x8x8xbf16>, vector<1x8x8xbf16>, vector<1x8x8xbf16> -> vector<4x8x8xbf16>
    %14 = vector.extract_strided_slice %4 {offsets = [0, 32], sizes = [8, 8], strides = [1, 1]} : vector<8x96xbf16> to vector<8x8xbf16>
    %15 = vector.extract_strided_slice %4 {offsets = [0, 40], sizes = [8, 8], strides = [1, 1]} : vector<8x96xbf16> to vector<8x8xbf16>
    %16 = vector.extract_strided_slice %4 {offsets = [0, 48], sizes = [8, 8], strides = [1, 1]} : vector<8x96xbf16> to vector<8x8xbf16>
    %17 = vector.extract_strided_slice %4 {offsets = [0, 56], sizes = [8, 8], strides = [1, 1]} : vector<8x96xbf16> to vector<8x8xbf16>
    %18 = vector.shape_cast %14 : vector<8x8xbf16> to vector<1x8x8xbf16>
    %19 = vector.shape_cast %15 : vector<8x8xbf16> to vector<1x8x8xbf16>
    %20 = vector.shape_cast %16 : vector<8x8xbf16> to vector<1x8x8xbf16>
    %21 = vector.shape_cast %17 : vector<8x8xbf16> to vector<1x8x8xbf16>
    %22 = tpu.concatenate %18, %19, %20, %21 in 0 : vector<1x8x8xbf16>, vector<1x8x8xbf16>, vector<1x8x8xbf16>, vector<1x8x8xbf16> -> vector<4x8x8xbf16>
    %23 = vector.extract_strided_slice %4 {offsets = [0, 64], sizes = [8, 8], strides = [1, 1]} : vector<8x96xbf16> to vector<8x8xbf16>
    %24 = vector.extract_strided_slice %4 {offsets = [0, 72], sizes = [8, 8], strides = [1, 1]} : vector<8x96xbf16> to vector<8x8xbf16>
    %25 = vector.extract_strided_slice %4 {offsets = [0, 80], sizes = [8, 8], strides = [1, 1]} : vector<8x96xbf16> to vector<8x8xbf16>
    %26 = vector.extract_strided_slice %4 {offsets = [0, 88], sizes = [8, 8], strides = [1, 1]} : vector<8x96xbf16> to vector<8x8xbf16>
    %27 = vector.shape_cast %23 : vector<8x8xbf16> to vector<1x8x8xbf16>
    %28 = vector.shape_cast %24 : vector<8x8xbf16> to vector<1x8x8xbf16>
    %29 = vector.shape_cast %25 : vector<8x8xbf16> to vector<1x8x8xbf16>
    %30 = vector.shape_cast %26 : vector<8x8xbf16> to vector<1x8x8xbf16>
    %31 = tpu.concatenate %27, %28, %29, %30 in 0 : vector<1x8x8xbf16>, vector<1x8x8xbf16>, vector<1x8x8xbf16>, vector<1x8x8xbf16> -> vector<4x8x8xbf16>
    "tpu.trace_start"() <{level = 10 : i32, message = "gtd,gsd->gts"}> : () -> ()
    %cst_3 = arith.constant dense<0.000000e+00> : vector<4x8x8xf32>
    %32 = tpu.matmul %13, %22, %cst_3 {dimension_numbers = #tpu.dot_dimension_numbers<[2], [2], [1], [1], [0, 0, 0, 1, 1, 1], [0], [0]>} : vector<4x8x8xbf16>, vector<4x8x8xbf16>, vector<4x8x8xf32> -> vector<4x8x8xf32>
    "tpu.trace_stop"() : () -> ()
    %33 = tpu.iota {dimensions = array<i32: 0>} : vector<8x8xi32>
    %34 = tpu.iota {dimensions = array<i32: 1>} : vector<8x8xi32>
    %35 = arith.cmpi sge, %33, %34 : vector<8x8xi32>
    %36 = vector.shape_cast %35 : vector<8x8xi1> to vector<1x8x8xi1>
    %cst_4 = arith.constant -1.000000e+30 : f32
    %37 = vector.shape_cast %36 : vector<1x8x8xi1> to vector<1x8x8xi1>
    %38 = vector.broadcast %37 : vector<1x8x8xi1> to vector<4x8x8xi1>
    %39 = vector.broadcast %cst_4 : f32 to vector<4x8x8xf32>
    %40 = arith.select %38, %32, %39 : vector<4x8x8xi1>, vector<4x8x8xf32>
    %cst_5 = arith.constant dense<0xFF800000> : vector<4x8xf32>
    %41 = vector.multi_reduction <maximumf>, %40, %cst_5 [2] : vector<4x8x8xf32> to vector<4x8xf32>
    %42 = vector.shape_cast %41 : vector<4x8xf32> to vector<4x8x1xf32>
    %43 = vector.broadcast %42 : vector<4x8x1xf32> to vector<4x8x8xf32>
    %44 = arith.subf %40, %43 : vector<4x8x8xf32>
    %45 = math.exp %44 : vector<4x8x8xf32>
    %cst_6 = arith.constant dense<0.000000e+00> : vector<4x8xf32>
    %46 = vector.multi_reduction <add>, %45, %cst_6 [2] : vector<4x8x8xf32> to vector<4x8xf32>
    %47 = vector.shape_cast %46 : vector<4x8xf32> to vector<4x8x1xf32>
    %48 = tpu.reciprocal %47 {approx = true} : vector<4x8x1xf32> -> vector<4x8x1xf32>
    %49 = vector.broadcast %48 : vector<4x8x1xf32> to vector<4x8x8xf32>
    %50 = arith.mulf %45, %49 : vector<4x8x8xf32>
    %51 = arith.truncf %50 : vector<4x8x8xf32> to vector<4x8x8xbf16>
    "tpu.trace_start"() <{level = 10 : i32, message = "gts,gsd->gtd"}> : () -> ()
    %cst_7 = arith.constant dense<0.000000e+00> : vector<4x8x8xf32>
    %52 = tpu.matmul %51, %31, %cst_7 {dimension_numbers = #tpu.dot_dimension_numbers<[2], [1], [1], [2], [0, 0, 0, 1, 1, 2], [0], [0]>} : vector<4x8x8xbf16>, vector<4x8x8xbf16>, vector<4x8x8xf32> -> vector<4x8x8xf32>
    "tpu.trace_stop"() : () -> ()
    %53 = arith.truncf %52 : vector<4x8x8xf32> to vector<4x8x8xbf16>
    %54 = vector.extract_strided_slice %53 {offsets = [0, 0, 0], sizes = [1, 8, 8], strides = [1, 1, 1]} : vector<4x8x8xbf16> to vector<1x8x8xbf16>
    %55 = vector.shape_cast %54 : vector<1x8x8xbf16> to vector<8x8xbf16>
    %56 = vector.extract_strided_slice %53 {offsets = [1, 0, 0], sizes = [1, 8, 8], strides = [1, 1, 1]} : vector<4x8x8xbf16> to vector<1x8x8xbf16>
    %57 = vector.shape_cast %56 : vector<1x8x8xbf16> to vector<8x8xbf16>
    %58 = vector.extract_strided_slice %53 {offsets = [2, 0, 0], sizes = [1, 8, 8], strides = [1, 1, 1]} : vector<4x8x8xbf16> to vector<1x8x8xbf16>
    %59 = vector.shape_cast %58 : vector<1x8x8xbf16> to vector<8x8xbf16>
    %60 = vector.extract_strided_slice %53 {offsets = [3, 0, 0], sizes = [1, 8, 8], strides = [1, 1, 1]} : vector<4x8x8xbf16> to vector<1x8x8xbf16>
    %61 = vector.shape_cast %60 : vector<1x8x8xbf16> to vector<8x8xbf16>
    %62 = tpu.concatenate %55, %57, %59, %61 in 1 : vector<8x8xbf16>, vector<8x8xbf16>, vector<8x8xbf16>, vector<8x8xbf16> -> vector<8x32xbf16>
    %c0_8 = arith.constant 0 : index
    %c0_9 = arith.constant 0 : index
    %63 = vector.load %arg3[%c0_8, %c0_9] : memref<32x32xbf16, #tpu.memory_space<vmem>>, vector<32x32xbf16>
    %cst_10 = arith.constant dense<0.000000e+00> : vector<8x32xf32>
    %64 = tpu.matmul %62, %63, %cst_10 {dimension_numbers = #tpu.dot_dimension_numbers<[1], [0], [0], [1], [0, 0, 1, 1], [], []>} : vector<8x32xbf16>, vector<32x32xbf16>, vector<8x32xf32> -> vector<8x32xf32>
    %c0_11 = arith.constant 0 : index
    %c0_12 = arith.constant 0 : index
    %65 = vector.load %arg4[%c0_11, %c0_12] : memref<1x32xf32, #tpu.memory_space<vmem>>, vector<1x32xf32>
    %66 = vector.broadcast %65 : vector<1x32xf32> to vector<8x32xf32>
    %67 = arith.addf %64, %66 : vector<8x32xf32>
    %c0_13 = arith.constant 0 : index
    %c0_14 = arith.constant 0 : index
    %68 = vector.load %arg5[%c0_13, %c0_14] : memref<8x32xf32, #tpu.memory_space<vmem>>, vector<8x32xf32>
    tpu.vector_store %arg5[%c0_13, %c0_14], %67 {strides = array<i32>} : memref<8x32xf32, #tpu.memory_space<vmem>>, vector<8x32xf32>,
    return
  }
  func.func @transform_0(%arg0: i32) -> (i32, i32) {
    %c0_i32 = arith.constant 0 : i32
    %c0_i32_0 = arith.constant 0 : i32
    return %arg0, %c0_i32 : i32, i32
  }
  func.func @transform_1(%arg0: i32) -> (i32, i32) {
    %c0_i32 = arith.constant 0 : i32
    %c0_i32_0 = arith.constant 0 : i32
    %c0_i32_1 = arith.constant 0 : i32
    return %c0_i32, %c0_i32_0 : i32, i32
  }
  func.func @transform_2(%arg0: i32) -> (i32, i32) {
    %c0_i32 = arith.constant 0 : i32
    %c0_i32_0 = arith.constant 0 : i32
    %c0_i32_1 = arith.constant 0 : i32
    return %c0_i32, %c0_i32_0 : i32, i32
  }
  func.func @transform_3(%arg0: i32) -> (i32, i32) {
    %c0_i32 = arith.constant 0 : i32
    %c0_i32_0 = arith.constant 0 : i32
    %c0_i32_1 = arith.constant 0 : i32
    return %c0_i32, %c0_i32_0 : i32, i32
  }
  func.func @transform_4(%arg0: i32) -> (i32, i32) {
    %c0_i32 = arith.constant 0 : i32
    %c0_i32_0 = arith.constant 0 : i32
    return %arg0, %c0_i32 : i32, i32
  }
}

</mosaic_0001>

<bundles_post_ra>
// kernel: tpu_custom_call.1
= control target key start
LH: loop header
LB: loop body
LE: loop exit
PB: predicated region body
PF: predicated region fallthrough
CT: control target
= control target key end

     0   :  { %9 = vsyncpa [#allocation3], 0  ;;  %s1229_s0 = inlined_call_operand.hbm [shape: f32[16,32], index: 0, kind: input, shape index: {}]   ;;  %s1230_s1 = inlined_call_operand.hbm [shape: bf16[32,96], index: 1, kind: input, shape index: {}]   ;;  %s1231_s2 = inlined_call_operand.hbm [shape: bf16[32,32], index: 2, kind: input, shape index: {}]   ;;  %s1232_s3 = inlined_call_operand.vmem [shape: f32[1,32], index: 3, kind: input, shape index: {}]   ;;  %s1233_s4 = inlined_call_operand.hbm [shape: f32[16,32], index: 4, kind: output, shape index: {}]  }
   0x1   :  { %11 = vsyncpa [#allocation3 + $0x1], 0 }
   0x2   :  { %12 = vsyncpa [#allocation6], 0 }
   0x3   :  { %13 = vsyncpa [#allocation4], 0 }
   0x4   :  { %15 = vsyncpa [#allocation4 + $0x1], 0  ;;  %s1037_s15 = smov 0   ;;  %s1039_s16 = smov 0  }
   0x5   :  { %s1041_s17 = smov 0   ;;  %s1043_s18 = smov 0  }
   0x6 LB: > { %s152_s21 = sshll.u32 %s1230_s1, 4  ;;  %s1061_s22 = sadd.s32 4294967295, %s998_s18   ;;  %s998_s18 = sphi %s1043_s18, %s1244_s18   ;;  %s994_s17 = sphi %s1041_s17, %s1243_s17   ;;  %s990_s16 = sphi %s1039_s16, %s1242_s16   ;;  %s986_s15 = sphi %s1037_s15, %s1241_s15   ;;  %s153_s21 = int_to_ptr.hbm [resolvable:$true] %s152_s21 }
   0x7   : > { %p699_p0 = scmp.ge.s32.totalorder %s998_s18, 1  ;;  %p42_p1 = scmp.eq.s32.totalorder %s1061_s22, 0 }
   0x8   : > { %p141_p2 = scmp.lt.s32.totalorder %s998_s18, 3  ;;  %s1000_s24 = smov [#allocation5]  }
   0x9   : > { %s154_s25 = sshll.u32 %s1000_s24, 4  ;;  %s166_s28 = sshll.u32 %s1231_s2, 4  ;;  %s155_s25 = int_to_ptr.vmem [resolvable:$true] %s154_s25  ;;  %s167_s28 = int_to_ptr.hbm [resolvable:$true] %s166_s28 }
   0xa   : > { %p1066_p3 = pnand %p699_p0, %p141_p2  ;;  %s1001_s29 = smov [#allocation7]  }
   0xb   : > { %s168_s30 = sshll.u32 %s1001_s29, 4  ;;  %s1002_s5 = smov 64   ;;  %s169_s30 = int_to_ptr.vmem [resolvable:$true] %s168_s30 }
   0xc   : > { %p756_p4 = pneg %p1066_p3  ;;  %s1003_s6 = smov 4  }
   0xd   : > { %s698_s7 = sadd.s32 4294967294, %s998_s18   ;;  %s1080_s8 = sadd.s32 1, %s998_s18  }
   0xe   : > { %p757_p6 = pnand %p756_p4, %p42_p1  ;;  %s25_s9 = ssub.s32 %s998_s18, %s1080_s8 }
   0xf   : > { %s28_s10 = sadd.s32 1, %s994_s17  ;;  %p26_p7 = scmp.eq.s32.totalorder %s25_s9, 0 }
  0x10   : > { %759 = dma.hbm_to_vmem [thread:$0]  (!%p757_p6), %s153_s21, 256, %s155_s25, [#allocation6], %s1002_s5, %s1002_s5, %s1003_s6  }
  0x11   : > { %762 = dma.hbm_to_vmem [thread:$0]  (!%p757_p6), %s167_s28, 256, %s169_s30, [#allocation6], %s1002_s5, %s1002_s5, %s1003_s6  }
  0x12   : > { %p35_p8 = scmp.ne.s32.totalorder %s994_s17, %s990_s16  ;;  %p36_p9 = scmp.eq.s32.totalorder %s998_s18, 0 }
  0x13   : > { %p41_p10 = scmp.ne.s32.totalorder %s990_s16, %s986_s15  ;;  %p128_p13 = scmp.eq.s32.totalorder %s1061_s22, 1 }
  0x14   : > { %s1091_s11 = scalar_select %p26_p7, %s994_s17, %s28_s10  }
  0x15   : > { %p1093_p11 = por %p36_p9, %p35_p8  ;;  %p1099_p12 = por %p42_p1, %p41_p10 }
  0x16   : > { %p134_p0 = scmp.eq.s32.totalorder %s698_s7, 1  ;;  %p773_p2 = scmp.lt.s32.totalorder %s998_s18, 2 }
  0x17   : > { %s185_s14 = sand.u32 1, %s994_s17   ;;  %p1106_p4 = por %p128_p13, %p35_p8 }
  0x18   : > { %p1110_p6 = por %p134_p0, %p41_p10  ;;  %s703_s21 = sshll.u32 %s185_s14, 3 }
  0x19   : > { %s704_s24 = sshll.u32 %s998_s18, 3  ;;  %s189_s28 = scalar_lea.vmem [#allocation2], %s703_s21 }
  0x1a   : > { %s193_s27 = scalar_lea.hbm %s1229_s0, %s704_s24  ;;  %s197_s29 = sshll.u32 %s189_s28, 4  ;;  %s198_s29 = int_to_ptr.vmem [resolvable:$true] %s197_s29 }
  0x1b   : > { %s195_s30 = sshll.u32 %s193_s27, 4  ;;  %p1120_p7 = pnand %p773_p2, %p1093_p11  ;;  %s196_s30 = int_to_ptr.hbm [resolvable:$true] %s195_s30 }
  0x1c   : > { %s186_s6 = scalar_lea.sflag [#allocation3], %s185_s14  ;;  %s898_s7 = sshra.s32 %s196_s30, 4  ;;  %s899_s7 = int_to_ptr.hbm [resolvable:$true] %s898_s7 }
  0x1d   : > { %s900_s9 = scalar_lea.hbm %s899_s7, 8  ;;  %p902_p9 = pneg %p1120_p7 }
  0x1e   : > { %p901_p8 = scmp.ne.s32.totalorder %s899_s7, %s900_s9  ;;  %s905_s24 = scalar_lea.hbm %s1229_s0, 16 }
  0x1f   : > { %p906_p11 = scmp.lt.s32.totalorder %s899_s7, %s1229_s0  ;;  %p907_p0 = scmp.lt.s32.totalorder %s905_s24, %s900_s9 }
  0x20   : > { %p903_p10 = pnand %p902_p9, %p901_p8 }
  0x21   : > { %p908_p2 = por %p907_p0, %p906_p11 }
  0x22   : > { %p904_p13 = pneg %p903_p10 }
  0x24   : > { %p909_p5 = pnand %p908_p2, %p904_p13 }
  0x26   : > { %912 = shalt.err (!%p909_p5)
}
  0x27   : > { %766 = dma.hbm_to_vmem [thread:$0]  (!%p1120_p7), %s196_s30, 128, %s198_s29, %s186_s6  }
  0x28   : > { %206 = sbr.rel (%p1066_p3) target bundleno = 1204 (0x4b4), region = 36  ;;  %s1137_s14 = sand.u32 (!%p1066_p3), 1, %s990_s16  }
  0x29   : > { %s706_s26 = sshll.u32 (!%p1066_p3), %s1137_s14, 3  ;;  %s209_s27 = scalar_lea.sflag (!%p1066_p3), [#allocation3], %s1137_s14 }
  0x2a   : > { %s212_s28 = scalar_lea.vmem (!%p1066_p3), [#allocation2], %s706_s26 }
  0x2d   : > { %973 = dma.done.wait (%p1099_p12), %s209_s27, 128  }
  0x2e   : > { %975 = vsyncadd (%p1099_p12), %s209_s27, 4294967168 }
  0x2f   : > { %977 = dma.done.wait (%p42_p1), [#allocation6], 512  }
  0x30   : > { %979 = vsyncadd (%p42_p1), [#allocation6], 4294966784  ;;  %v741_v0 = vld [vmem:[#allocation5 + $0x8] sm:$0xff]  ;;  %v740_v1 = vld [vmem:[#allocation5] sm:$0xff]  ;;  %vm267_vm0 = vcmask 261120   ;;  %s1004_s23 = smov 104   ;;  %v385_v28 = vlaneseq }
  0x31   : > { %277 = vmatpush.bf16.msra.mxu0 %v741_v0  ;;  %v249_v2 = vld [vmem:[%s212_s28] sm:$0xff]  ;;  %s1005_s13 = smov 120   ;;  %s1006_s29 = smov 112   ;;  %vm296_vm1 = vcmask 64512   ;;  %vm449_vm3 = vcmask 1043456   ;;  %vm551_vm4 = vcmask 130048  }
  0x32   : > { %v250_v3 = vpack.c.bf16 %v249_v2, %v249_v2  ;;  %s1007_s30 = smov 96   ;;  %v386_v29 = vshrl.u32 %v385_v28, 7  ;;  %v388_v30 = vand.u32 127, %v385_v28  ;;  %s1008_s5 = smov 64   ;;  %vm554_vm5 = vcmask 195584  }
  0x33   : > { %s1009_s6 = smov 16   ;;  %s1010_s7 = smov 8  }
  0x34   : > { %vm389_vm2 = vcmp.ge.s32.totalorder %v386_v29, %v388_v30  ;;  %s1011_s9 = smov 24   ;;  %s737_s10 = sshll.u32 %s1061_s22, 3 }
  0x35   : > { %278 = vmatpush.bf16.msra.mxu0 %v740_v1  ;;  %s604_s25 = scalar_lea.hbm %s1233_s4, %s737_s10  ;;  %s247_s28 = scalar_lea.vmem [#allocation8], %s706_s26 }
  0x36   : > { %s594_s22 = scalar_lea.sflag [#allocation4], %s1137_s14  ;;  %s948_s26 = scalar_lea.hbm %s1233_s4, 16 }
  0x38   : > { %718 = vmatmul.msk.bf16.vlgmr.msra.gmra.mxu0 %vm267_vm0, %v250_v3 }
  0xb5   : > { %v280_v4 = vpop.f32.mrf.mxu0 }
  0xb6   : > { %v284_v5 = vpack.c.bf16 %v280_v4, %v280_v4 }
  0xb8   : > { %290 = vrot.lane.b32.xlu1 %v284_v5, %s1004_s23  ;;  %286 = vrot.lane.b32.xlu0 %v284_v5, %s1005_s13  ;;  %v292_v7 = vunpack.c.l.b16 %v284_v5  ;;  %s606_s23 = sshll.u32 %s247_s28, 4  ;;  %s608_s13 = sshll.u32 %s604_s25, 4  ;;  %s607_s23 = int_to_ptr.vmem [resolvable:$true] %s606_s23  ;;  %s609_s13 = int_to_ptr.hbm [resolvable:$true] %s608_s13 }
  0xba   : > { %v1152_v8 = vpack.c.b16 %v292_v7, %v292_v7 }
  0xbd   : > { %v282_v6 = vpop.f32.mrf.mxu0 }
  0xc0   : > { %288 = vrot.lane.b32.xlu0 %v284_v5, %s1006_s29  ;;  %s942_s29 = sshra.s32 %s609_s13, 4  ;;  %s943_s29 = int_to_ptr.hbm [resolvable:$true] %s942_s29 }
  0xc1   : > { %p949_p12 = scmp.lt.s32.totalorder %s943_s29, %s1233_s4 }
  0xc8   : > { %294 = vrot.lane.b32.xlu0 %v1152_v8, %s1007_s30 }
 0x12a   : > { %v287_v9 = vpop.permute.xlu0 %286  ;;  %v291_v15 = vpop.permute.xlu1 %290 }
 0x12b   : > { %v316_v10 = vunpack.c.l.b16 %v287_v9  ;;  %v362_v16 = vunpack.c.l.b16 %v291_v15 }
 0x12d   : > { %v1155_v11 = vpack.c.b16 %v316_v10, %v316_v10  ;;  %v363_v19 = vpack.c.b16 %v362_v16, %v362_v16 }
 0x12f   : > { %318 = vrot.lane.b32.xlu1 %v1155_v11, %s1007_s30 }
 0x132   : > { %v289_v12 = vpop.permute.xlu0 %288 }
 0x133   : > { %v339_v13 = vunpack.c.l.b16 %v289_v12 }
 0x135   : > { %v1158_v14 = vpack.c.b16 %v339_v13, %v339_v13 }
 0x137   : > { %341 = vrot.lane.b32.xlu2 %v1158_v14, %s1007_s30 }
 0x13a   : > { %v295_v17 = vpop.permute.xlu0 %294 }
 0x13b   : > { %v301_v18 = vsel %vm296_vm1, %v295_v17, 0 }
 0x13c   : > { %310 = vmatpush.bf16.xpose.msra.mxu1 %v301_v18 }
 0x13f   : > { %364 = vrot.lane.b32.xlu2 %v363_v19, %s1007_s30  ;;  %s944_s30 = scalar_lea.hbm %s943_s29, 8 }
 0x140   : > { %p945_p1 = scmp.ne.s32.totalorder %s943_s29, %s944_s30  ;;  %p950_p7 = scmp.lt.s32.totalorder %s948_s26, %s944_s30 }
 0x142   : > { %p946_p3 = pnand %p945_p1, %p1106_p4  ;;  %p951_p8 = por %p950_p7, %p949_p12 }
 0x143   : > { %719 = vmatmul.msk.bf16.vlgmr.msra.gmra.mxu1 %vm296_vm1, %v284_v5 }
 0x144   : > { %p947_p5 = pneg %p946_p3 }
 0x146   : > { %p952_p9 = pnand %p951_p8, %p947_p5 }
 0x191   : > { %v342_v20 = vpop.permute.xlu2 %341 }
 0x192   : > { %v347_v21 = vsel %vm296_vm1, %v342_v20, 0 }
 0x193   : > { %356 = vmatpush.bf16.xpose.msra.mxu3 %v347_v21 }
 0x199   : > { %v365_v22 = vpop.permute.xlu2 %364 }
 0x19a   : > { %721 = vmatmul.msk.bf16.vlgmr.msra.gmra.mxu3 %vm296_vm1, %v289_v12  ;;  %v370_v23 = vsel %vm296_vm1, %v365_v22, 0 }
 0x19b   : > { %379 = vmatpush.bf16.xpose.msrb.mxu0 %v370_v23 }
 0x1a1   : > { %v319_v24 = vpop.permute.xlu1 %318 }
 0x1a2   : > { %722 = vmatmul.msk.bf16.vlgmr.msrb.gmra.mxu0 %vm296_vm1, %v291_v15  ;;  %v324_v25 = vsel %vm296_vm1, %v319_v24, 0 }
 0x1a3   : > { %333 = vmatpush.bf16.xpose.msra.mxu2 %v324_v25 }
 0x1aa   : > { %720 = vmatmul.msk.bf16.vlgmr.msra.gmra.mxu2 %vm296_vm1, %v287_v9 }
 0x1c0   : > { %v312_v26 = vpop.f32.mrf.mxu1 }
 0x1c1   : > { %v392_v37 = vsel %vm389_vm2, %v312_v26, -1e+30 }
 0x1c2   : > { %v396_v40 = vsel %vm296_vm1, %v392_v37, -inf }
 0x1c8   : > { %v314_v27 = vpop.f32.mrf.mxu1 }
 0x21d   : > { %v358_v31 = vpop.f32.mrf.mxu3 }
 0x21e   : > { %v394_v32 = vsel %vm389_vm2, %v358_v31, -1e+30 }
 0x21f   : > { %v381_v33 = vpop.f32.mrf.mxu0  ;;  %v402_v34 = vsel %vm296_vm1, %v394_v32, -inf }
 0x220   : > { %v395_v35 = vsel %vm389_vm2, %v381_v33, -1e+30  ;;  %403 = vmax.xlane.f32.xlu2 %v402_v34 }
 0x221   : > { %v405_v36 = vsel %vm296_vm1, %v395_v35, -inf }
 0x222   : > { %406 = vmax.xlane.f32.xlu0 %v405_v36 }
 0x225   : > { %v360_v38 = vpop.f32.mrf.mxu3 }
 0x227   : > { %v383_v39 = vpop.f32.mrf.mxu0 }
 0x228   : > { %397 = vmax.xlane.f32.xlu2 %v396_v40 }
 0x22d   : > { %v335_v41 = vpop.f32.mrf.mxu2 }
 0x22e   : > { %v393_v42 = vsel %vm389_vm2, %v335_v41, -1e+30 }
 0x22f   : > { %v399_v43 = vsel %vm296_vm1, %v393_v42, -inf }
 0x230   : > { %400 = vmax.xlane.f32.xlu1 %v399_v43  ;;  %v742_v43 = vld [vmem:[#allocation7] sm:$0xff] }
 0x235   : > { %v337_v44 = vpop.f32.mrf.mxu2 }
 0x293   : > { %v404_v45 = vpop.xlane.xlu2 %403 }
 0x294   : > { %v410_v46 = vsub.f32 %v394_v32, %v404_v45 }
 0x295   : > { %v407_v47 = vpop.xlane.xlu0 %406 }
 0x296   : > { %v416_v48 = vmul.f32 1.442695, %v410_v46  ;;  %v411_v49 = vsub.f32 %v395_v35, %v407_v47 }
 0x298   : > { %822 = vpow2.f32 %v416_v48  ;;  %v418_v50 = vmul.f32 1.442695, %v411_v49 }
 0x29a   : > { %824 = vpow2.f32 %v418_v50 }
 0x29b   : > { %v398_v60 = vpop.xlane.xlu2 %397 }
 0x29c   : > { %v408_v61 = vsub.f32 %v392_v37, %v398_v60 }
 0x29e   : > { %v823_v51 = vpop.eup %822  ;;  %v412_v62 = vmul.f32 1.442695, %v408_v61 }
 0x29f   : > { %v426_v52 = vsel %vm296_vm1, %v823_v51, 0.0 }
 0x2a0   : > { %v825_v53 = vpop.eup %824  ;;  %427 = vadd.xlane.f32.xlu2 %v426_v52 }
 0x2a1   : > { %v429_v54 = vsel %vm296_vm1, %v825_v53, 0.0 }
 0x2a2   : > { %430 = vadd.xlane.f32.xlu0 %v429_v54 }
 0x2a3   : > { %v401_v55 = vpop.xlane.xlu1 %400 }
 0x2a4   : > { %v409_v56 = vsub.f32 %v393_v42, %v401_v55  ;;  %v743_v42 = vld [vmem:[#allocation7 + $0x8] sm:$0xff] }
 0x2a6   : > { %v414_v57 = vmul.f32 1.442695, %v409_v56 }
 0x2a8   : > { %826 = vpow2.f32 %v414_v57 }
 0x2a9   : > { %828 = vpow2.f32 %v412_v62 }
 0x2ae   : > { %v827_v58 = vpop.eup %826 }
 0x2af   : > { %v423_v59 = vsel %vm296_vm1, %v827_v58, 0.0  ;;  %v829_v63 = vpop.eup %828 }
 0x2b0   : > { %424 = vadd.xlane.f32.xlu1 %v423_v59  ;;  %v420_v0 = vsel %vm296_vm1, %v829_v63, 0.0 }
 0x2b6   : > { %508 = vrot.lane.b32.xlu0 %v363_v19, %s1008_s5 }
 0x2b8   : > { %487 = vrot.lane.b32.xlu2 %v1158_v14, %s1008_s5 }
 0x2be   : > { %444 = vrot.lane.b32.xlu0 %v1152_v8, %s1008_s5 }
 0x2c9   : > { %466 = vrot.lane.b32.xlu1 %v1155_v11, %s1008_s5 }
 0x2f3   : > { %421 = vadd.xlane.f32.xlu1 %v420_v0 }
 0x313   : > { %v428_v1 = vpop.xlane.xlu2 %427 }
 0x314   : > { %830 = vrcp.f32 %v428_v1 }
 0x315   : > { %v431_v4 = vpop.xlane.xlu0 %430 }
 0x316   : > { %832 = vrcp.f32 %v431_v4 }
 0x31a   : > { %v831_v2 = vpop.eup %830 }
 0x31b   : > { %v438_v3 = vmul.f32 %v831_v2, %v823_v51  ;;  %v488_v5 = vpop.permute.xlu2 %487  ;;  %v821_v51 = vld [vmem:[%s1232_s3] ss:$0 sm:$0xff] }
 0x31c   : > { %v493_v6 = vsel %vm449_vm3, %v488_v5, 0  ;;  %v833_v8 = vpop.eup %832 }
 0x31d   : > { %502 = vmatpush.bf16.msrb.mxu3 %v493_v6  ;;  %v442_v7 = vpack.c.bf16 %v438_v3, %v438_v3  ;;  %v439_v9 = vmul.f32 %v833_v8, %v825_v53 }
 0x31f   : > { %v443_v12 = vpack.c.bf16 %v439_v9, %v439_v9 }
 0x320   : > { %725 = vmatmul.msk.bf16.vlgmr.msrb.gmra.mxu3 %vm296_vm1, %v442_v7 }
 0x323   : > { %v425_v13 = vpop.xlane.xlu1 %424 }
 0x324   : > { %834 = vrcp.f32 %v425_v13 }
 0x328   : > { %v509_v10 = vpop.permute.xlu0 %508 }
 0x329   : > { %v514_v11 = vsel %vm449_vm3, %v509_v10, 0 }
 0x32a   : > { %523 = vmatpush.bf16.msra.mxu0 %v514_v11  ;;  %v835_v16 = vpop.eup %834 }
 0x32b   : > { %v437_v17 = vmul.f32 %v835_v16, %v827_v58 }
 0x32d   : > { %726 = vmatmul.msk.bf16.vlgmr.msra.gmra.mxu0 %vm296_vm1, %v443_v12  ;;  %v441_v20 = vpack.c.bf16 %v437_v17, %v437_v17 }
 0x330   : > { %v445_v14 = vpop.permute.xlu0 %444 }
 0x331   : > { %v451_v15 = vsel %vm449_vm3, %v445_v14, 0 }
 0x332   : > { %460 = vmatpush.bf16.msrb.mxu1 %v451_v15 }
 0x336   : > { %585 = vmatpush.bf16.msra.mxu1 %v743_v42 }
 0x33a   : > { %586 = vmatpush.bf16.msra.mxu1 %v742_v43 }
 0x33b   : > { %v467_v18 = vpop.permute.xlu1 %466 }
 0x33c   : > { %v472_v19 = vsel %vm449_vm3, %v467_v18, 0 }
 0x33d   : > { %481 = vmatpush.bf16.msrb.mxu2 %v472_v19 }
 0x340   : > { %724 = vmatmul.msk.bf16.vlgmr.msrb.gmra.mxu2 %vm296_vm1, %v441_v20 }
 0x366   : > { %v422_v21 = vpop.xlane.xlu1 %421 }
 0x367   : > { %836 = vrcp.f32 %v422_v21 }
 0x36d   : > { %v837_v22 = vpop.eup %836 }
 0x36e   : > { %v436_v23 = vmul.f32 %v837_v22, %v829_v63 }
 0x370   : > { %v440_v24 = vpack.c.bf16 %v436_v23, %v436_v23 }
 0x372   : > { %723 = vmatmul.msk.bf16.vlgmr.msrb.gmra.mxu1 %vm296_vm1, %v440_v24 }
 0x3a3   : > { %v504_v25 = vpop.f32.mrf.mxu3 }
 0x3a4   : > { %v531_v26 = vpack.c.bf16 %v504_v25, %v504_v25 }
 0x3a6   : > { %v539_v27 = vunpack.c.l.b16 %v531_v26 }
 0x3a8   : > { %v540_v28 = vpack.c.b16 %v539_v27, %v539_v27 }
 0x3aa   : > { %541 = vrot.lane.b32.xlu0 %v540_v28, %s1009_s6  ;;  %v525_v29 = vpop.f32.mrf.mxu0 }
 0x3ab   : > { %v506_v30 = vpop.f32.mrf.mxu3  ;;  %v532_v35 = vpack.c.bf16 %v525_v29, %v525_v29 }
 0x3ad   : > { %v544_v38 = vunpack.c.l.b16 %v532_v35 }
 0x3af   : > { %v545_v39 = vpack.c.b16 %v544_v38, %v544_v38 }
 0x3b2   : > { %v527_v31 = vpop.f32.mrf.mxu0 }
 0x3c3   : > { %v483_v32 = vpop.f32.mrf.mxu2 }
 0x3c4   : > { %v530_v33 = vpack.c.bf16 %v483_v32, %v483_v32 }
 0x3c6   : > { %v534_v34 = vunpack.c.l.b16 %v530_v33 }
 0x3c8   : > { %v535_v36 = vpack.c.b16 %v534_v34, %v534_v34 }
 0x3ca   : > { %536 = vrot.lane.b32.xlu2 %v535_v36, %s1010_s7 }
 0x3cb   : > { %v485_v37 = vpop.f32.mrf.mxu2 }
 0x3d2   : > { %546 = vrot.lane.b32.xlu2 %v545_v39, %s1011_s9 }
 0x3ef   : > { %v462_v40 = vpop.f32.mrf.mxu1 }
 0x3f0   : > { %v529_v45 = vpack.c.bf16 %v462_v40, %v462_v40 }
 0x3f7   : > { %v464_v41 = vpop.f32.mrf.mxu1 }
 0x41c   : > { %v542_v47 = vpop.permute.xlu0 %541 }
 0x424   : > { %v537_v44 = vpop.permute.xlu2 %536 }
 0x425   : > { %v550_v46 = vsel %vm296_vm1, %v529_v45, %v537_v44 }
 0x426   : > { %v553_v48 = vsel %vm551_vm4, %v550_v46, %v542_v47 }
 0x42c   : > { %v547_v49 = vpop.permute.xlu2 %546 }
 0x42d   : > { %v556_v50 = vsel %vm554_vm5, %v553_v48, %v547_v49 }
 0x42e   : > { %735 = vmatmul.msk.bf16.vlgmr.msra.gmra.mxu1 %vm267_vm0, %v556_v50 }
 0x4ab   : > { %v588_v52 = vpop.f32.mrf.mxu1 }
 0x4ac   : > { %v589_v53 = vadd.f32 %v821_v51, %v588_v52 }
 0x4ae   : > { %592 = vst.msk [vmem:[%s247_s28] sm:$0xff] %vm267_vm0, %v589_v53 }
 0x4af   : > { %955 = shalt.err (!%p952_p9)
}
 0x4b0   : > { %754 = dma.vmem_to_hbm [thread:$0]  (%p1106_p4), %s607_s23, 128, %s609_s13, %s594_s22  }
 0x4b3   : > { %v590_v54 = vpop.f32.mrf.mxu1 }
 0x4b4 PF: > { %s620_s14 = sand.u32 1, %s986_s15   ;;  %p1240_p10 = scmp.ge.s32.totalorder %s998_s18, 2 }
 0x4b5   : > { %s621_s10 = scalar_lea.sflag [#allocation4], %s620_s14 }
 0x4b6   : > { %p768_p13 = pnand %p1240_p10, %p1110_p6 }
 0x4b8   : > { %p769_p11 = pneg %p768_p13 }
 0x4ba   : > { %981 = dma.done.wait (%p769_p11), %s621_s10, 128  }
 0x4bb   : > { %983 = vsyncadd (%p769_p11), %s621_s10, 4294967168  ;;  %p18_p0 = scmp.ge.s32.totalorder %s1080_s8, 4   ;;  %s1241_s15 = smov %s990_s16 }
 0x4bc   : > { %s1242_s16 = smov %s994_s17  ;;  %s1243_s17 = smov %s1091_s11 }
 0x4bd   : > { %s1244_s18 = smov %s1080_s8  ;;  %20 = sbr.rel (!%p18_p0) target bundleno = 6 (0x6), region = 89 }
 0x4c2   :  { %627 = vsyncpa [#allocation3], 1 }
 0x4c3   :  { %629 = vsyncpa [#allocation3 + $0x1], 1 }
 0x4c4   :  { %630 = vsyncpa [#allocation6], 1 }
 0x4c5   :  { %631 = vsyncpa [#allocation4], 1 }
 0x4c6   :  { %633 = vsyncpa [#allocation4 + $0x1], 1 }

</bundles_post_ra>
